<compile_context>
chip_gen: v5e
topology: v5e:2x2
jax: 0.10.0
libtpu: 0.0.40
codegen_flags: <defaults>
</compile_context>

<pallas_src>
import functools

import jax
import jax.numpy as jnp
from jax import lax
from jax.experimental import pallas as pl
from jax.experimental.pallas import tpu as pltpu


_MASK_VALUE = -0.7 * float(jnp.finfo(jnp.float32).max)  # large finite negative (NaN-safe)


def _round_up(x, m):
    return ((x + m - 1) // m) * m


# ---------------------------------------------------------------------------
# Fused kernel: per-batch QKV projection into VMEM + causal attention per q tile
# ---------------------------------------------------------------------------
def _head_kernel(x_ref, w_ref, o_ref, q_scr, k_scr, v_scr, *, head_size, q_tile, scale):
    H = head_size
    qi = pl.program_id(1)

    # ---- once per batch: project the whole sequence to q/k/v, keep in VMEM ----
    @pl.when(qi == 0)
    def _project():
        x = x_ref[0].astype(jnp.bfloat16)                 # (T_pad, C)
        w = w_ref[...].astype(jnp.bfloat16)               # (C, 3H) = [Wq^T | Wk^T | Wv^T]
        qkv = jnp.dot(x, w, preferred_element_type=jnp.float32)   # one MXU pass, N = 3H
        q_scr[...] = (qkv[:, 0:H] * scale).astype(q_scr.dtype)    # pre-scale q (T*H muls)
        k_scr[...] = qkv[:, H:2 * H].astype(k_scr.dtype)
        v_scr[...] = qkv[:, 2 * H:3 * H].astype(v_scr.dtype)

    # ---- per q tile: dense causal attention against the resident k/v ----
    q_start = pl.multiple_of(qi * q_tile, q_tile)
    q = q_scr[pl.ds(q_start, q_tile), :]                  # (tq, H) bf16, already scaled
    k = k_scr[...]                                        # (T_pad, H) bf16
    v = v_scr[...]                                        # (T_pad, H) bf16

    # contract on H of both operands -> no k transpose / XLU copy
    s = lax.dot_general(q, k, dimension_numbers=(((1,), (1,)), ((), ())),
                        preferred_element_type=jnp.float32)        # (tq, T_pad) f32

    row = q_start + lax.broadcasted_iota(jnp.int32, s.shape, 0)
    col = lax.broadcasted_iota(jnp.int32, s.shape, 1)
    s = jnp.where(col <= row, s, _MASK_VALUE)             # causal mask (also kills padded kv cols)

    m = jnp.max(s, axis=-1, keepdims=True)                # (tq, 1)
    p = jnp.exp(s - m)                                    # (tq, T_pad) f32; masked cols underflow to 0
    p_bf = p.astype(v.dtype)

    # numerator on the MXU
    pv = jnp.dot(p_bf, v, preferred_element_type=jnp.float32)              # (tq, H)
    # softmax denominator also on the (idle) MXU instead of an XLU lane reduce
    ones_col = jnp.ones((k.shape[0], 1), dtype=v.dtype)
    l = jnp.dot(p_bf, ones_col, preferred_element_type=jnp.float32)        # (tq, 1)

    inv_l = pl.reciprocal(l, approx=False)                # exact reciprocal (f32 accuracy)
    o_ref[0] = (pv * inv_l).astype(o_ref.dtype)


# ---------------------------------------------------------------------------
# Public wrapper matching the PyTorch module's forward (eval mode)
# ---------------------------------------------------------------------------
def head_forward(x, wq, wk, wv, *, q_tile=256):
    """x: (B, T, C); wq/wk/wv: PyTorch Linear weights of shape (H, C)."""
    assert q_tile % 8 == 0
    B, T, C = x.shape
    H = wq.shape[0]
    scale = float(C) ** -0.5          # module scales by n_embedd C (intentional, nonstandard)

    # Glue: fuse the three Linear weights into one (C, 3H) operand so x @ Wqkv == x @ [Wq|Wk|Wv]^T.
    wqkv = jnp.concatenate([wq.T, wk.T, wv.T], axis=1)

    # Pad T so every q tile is full and sublane-aligned; the causal mask neutralises the
    # padded kv columns and padded q rows are sliced away afterwards.
    tq = q_tile if T >= q_tile else _round_up(T, 8)
    grid_q = pl.cdiv(T, tq)
    t_pad = grid_q * tq
    x_in = x if t_pad == T else jnp.pad(x, ((0, 0), (0, t_pad - T), (0, 0)))

    kernel = functools.partial(_head_kernel, head_size=H, q_tile=tq, scale=scale)
    itemsize = jnp.dtype(x.dtype).itemsize

    out = pl.pallas_call(
        kernel,
        out_shape=jax.ShapeDtypeStruct((B, t_pad, H), x.dtype),
        grid_spec=pltpu.PrefetchScalarGridSpec(
            num_scalar_prefetch=0,
            grid=(B, grid_q),
            in_specs=[
                # whole sequence of the current batch; block index constant over qi -> one DMA per batch
                pl.BlockSpec((1, t_pad, C), lambda b, qi: (b, 0, 0)),
                # fused weights; constant block index -> DMA'd once for the whole call
                pl.BlockSpec((C, 3 * H), lambda b, qi: (0, 0)),
            ],
            out_specs=pl.BlockSpec((1, tq, H), lambda b, qi: (b, qi, 0)),
            scratch_shapes=[
                pltpu.VMEM((t_pad, H), jnp.bfloat16),   # q (pre-scaled), resident per batch
                pltpu.VMEM((t_pad, H), jnp.bfloat16),   # k, resident per batch
                pltpu.VMEM((t_pad, H), jnp.bfloat16),   # v, resident per batch
            ],
        ),
        compiler_params=pltpu.CompilerParams(
            dimension_semantics=("parallel", "arbitrary"),
        ),
        cost_estimate=pl.CostEstimate(
            flops=(2 * B * t_pad * C * 3 * H            # fused qkv projection
                   + 2 * B * t_pad * t_pad * H          # q @ k^T
                   + 2 * B * t_pad * t_pad * (H + 1)),  # p @ v and p @ ones
            transcendentals=B * t_pad * t_pad,
            bytes_accessed=(B * t_pad * C * itemsize    # x read once per batch
                            + C * 3 * H * itemsize      # weights once
                            + B * t_pad * H * itemsize),  # output write
        ),
    )(x_in, wqkv)

    return out if t_pad == T else out[:, :T, :]


def head_forward_ref(x, wq, wk, wv):
    """Pure-JAX f32 reference matching the PyTorch forward (eval mode, 'naive' pos enc)."""
    B, T, C = x.shape
    q = x @ wq.T
    k = x @ wk.T
    v = x @ wv.T
    s = (q @ jnp.swapaxes(k, -2, -1)) * (float(C) ** -0.5)
    mask = jnp.tril(jnp.ones((T, T), dtype=bool))
    s = jnp.where(mask, s, -jnp.inf)
    wei = jax.nn.softmax(s, axis=-1)
    return wei @ v


if __name__ == "__main__":
    # Module hyperparameters (small, consistent with defaults)
    B, T = 2, 8            # batch, sequence length (== block_size)
    n_embedd = 32          # C
    head_size = 16         # attention_head_size

    key = jax.random.PRNGKey(0)
    kx, kq, kk, kv = jax.random.split(key, 4)

    x = jax.random.normal(kx, (B, T, n_embedd), dtype=jnp.float32)
    # Deterministic "nn.Linear(bias=False)" weights, shape (out_features, in_features)
    wq = jax.random.normal(kq, (head_size, n_embedd), dtype=jnp.float32) * 0.1
    wk = jax.random.normal(kk, (head_size, n_embedd), dtype=jnp.float32) * 0.1
    wv = jax.random.normal(kv, (head_size, n_embedd), dtype=jnp.float32) * 0.1

    out = head_forward(x, wq, wk, wv)
    out = jax.block_until_ready(out)

    ref = head_forward_ref(x, wq, wk, wv)
    assert out.shape == (B, T, head_size)
    # bf16 MXU operands with f32 accumulation -> compare at bf16-appropriate tolerance
    assert jnp.allclose(out, ref, atol=2e-2, rtol=2e-2), "mismatch vs reference"

    print("KERNEL_OK")
</pallas_src>

<mosaic_0001>
module attributes {stable_mosaic.version = 11 : i64} {
  func.func @_head_kernel(%arg0: i32, %arg1: i32, %arg2: memref<1x8x32xf32, #tpu.memory_space<vmem>>, %arg3: memref<32x48xf32, #tpu.memory_space<vmem>>, %arg4: memref<1x8x16xf32, #tpu.memory_space<vmem>>, %arg5: memref<8x16xbf16, #tpu.memory_space<vmem>>, %arg6: memref<8x16xbf16, #tpu.memory_space<vmem>>, %arg7: memref<8x16xbf16, #tpu.memory_space<vmem>>) attributes {dimension_semantics = [#tpu.dimension_semantics<parallel>, #tpu.dimension_semantics<arbitrary>], iteration_bounds = array<i64: 2, 1>, scalar_prefetch = 0 : i64, scratch_operands = 3 : i64, tpu.core_type = #tpu.core_type<tc>, window_params = [{transform_indices = @transform_0, window_bounds = array<i64: 1, 8, 32>}, {pipeline_mode = #tpu.pipeline_mode<synchronous>, transform_indices = @transform_1, window_bounds = array<i64: 32, 48>}, {transform_indices = @transform_2, window_bounds = array<i64: 1, 8, 16>}]} {
    %c0_i32 = arith.constant 0 : i32
    %0 = arith.cmpi eq, %arg1, %c0_i32 : i32
    %1 = arith.extui %0 : i1 to i32
    %c0_i32_0 = arith.constant 0 : i32
    %2 = arith.cmpi ne, %1, %c0_i32_0 : i32
    scf.if %2 {
      %c0_13 = arith.constant 0 : index
      %c0_14 = arith.constant 0 : index
      %c0_15 = arith.constant 0 : index
      %32 = vector.load %arg2[%c0_13, %c0_14, %c0_15] : memref<1x8x32xf32, #tpu.memory_space<vmem>>, vector<1x8x32xf32>
      %33 = vector.shape_cast %32 : vector<1x8x32xf32> to vector<8x32xf32>
      %34 = arith.truncf %33 : vector<8x32xf32> to vector<8x32xbf16>
      %c0_16 = arith.constant 0 : index
      %c0_17 = arith.constant 0 : index
      %35 = vector.load %arg3[%c0_16, %c0_17] : memref<32x48xf32, #tpu.memory_space<vmem>>, vector<32x48xf32>
      %36 = arith.truncf %35 : vector<32x48xf32> to vector<32x48xbf16>
      %cst_18 = arith.constant dense<0.000000e+00> : vector<8x48xf32>
      %37 = tpu.matmul %34, %36, %cst_18 {dimension_numbers = #tpu.dot_dimension_numbers<[1], [0], [0], [1], [0, 0, 1, 1], [], []>} : vector<8x32xbf16>, vector<32x48xbf16>, vector<8x48xf32> -> vector<8x48xf32>
      %38 = vector.extract_strided_slice %37 {offsets = [0, 0], sizes = [8, 16], strides = [1, 1]} : vector<8x48xf32> to vector<8x16xf32>
      %cst_19 = arith.constant 0.176776692 : f32
      %39 = vector.broadcast %cst_19 : f32 to vector<8x16xf32>
      %40 = arith.mulf %38, %39 : vector<8x16xf32>
      %41 = arith.truncf %40 : vector<8x16xf32> to vector<8x16xbf16>
      %c0_20 = arith.constant 0 : index
      %c0_21 = arith.constant 0 : index
      %42 = vector.load %arg5[%c0_20, %c0_21] : memref<8x16xbf16, #tpu.memory_space<vmem>>, vector<8x16xbf16>
      tpu.vector_store %arg5[%c0_20, %c0_21], %41 {strides = array<i32>} : memref<8x16xbf16, #tpu.memory_space<vmem>>, vector<8x16xbf16>,
      %43 = vector.extract_strided_slice %37 {offsets = [0, 16], sizes = [8, 16], strides = [1, 1]} : vector<8x48xf32> to vector<8x16xf32>
      %44 = arith.truncf %43 : vector<8x16xf32> to vector<8x16xbf16>
      %c0_22 = arith.constant 0 : index
      %c0_23 = arith.constant 0 : index
      %45 = vector.load %arg6[%c0_22, %c0_23] : memref<8x16xbf16, #tpu.memory_space<vmem>>, vector<8x16xbf16>
      tpu.vector_store %arg6[%c0_22, %c0_23], %44 {strides = array<i32>} : memref<8x16xbf16, #tpu.memory_space<vmem>>, vector<8x16xbf16>,
      %46 = vector.extract_strided_slice %37 {offsets = [0, 32], sizes = [8, 16], strides = [1, 1]} : vector<8x48xf32> to vector<8x16xf32>
      %47 = arith.truncf %46 : vector<8x16xf32> to vector<8x16xbf16>
      %c0_24 = arith.constant 0 : index
      %c0_25 = arith.constant 0 : index
      %48 = vector.load %arg7[%c0_24, %c0_25] : memref<8x16xbf16, #tpu.memory_space<vmem>>, vector<8x16xbf16>
      tpu.vector_store %arg7[%c0_24, %c0_25], %47 {strides = array<i32>} : memref<8x16xbf16, #tpu.memory_space<vmem>>, vector<8x16xbf16>,
    } else {
    }
    %c8_i32 = arith.constant 8 : i32
    %3 = arith.muli %arg1, %c8_i32 : i32
    %4 = tpu.assume_multiple %3, 8 : i32
    %5 = arith.index_cast %4 : i32 to index
    %c0 = arith.constant 0 : index
    %6 = vector.load %arg5[%5, %c0] : memref<8x16xbf16, #tpu.memory_space<vmem>>, vector<8x16xbf16>
    %c0_1 = arith.constant 0 : index
    %c0_2 = arith.constant 0 : index
    %7 = vector.load %arg6[%c0_1, %c0_2] : memref<8x16xbf16, #tpu.memory_space<vmem>>, vector<8x16xbf16>
    %c0_3 = arith.constant 0 : index
    %c0_4 = arith.constant 0 : index
    %8 = vector.load %arg7[%c0_3, %c0_4] : memref<8x16xbf16, #tpu.memory_space<vmem>>, vector<8x16xbf16>
    %cst = arith.constant dense<0.000000e+00> : vector<8x8xf32>
    %9 = tpu.matmul %6, %7, %cst {dimension_numbers = #tpu.dot_dimension_numbers<[1], [1], [0], [0], [0, 0, 1, 0], [], []>} : vector<8x16xbf16>, vector<8x16xbf16>, vector<8x8xf32> -> vector<8x8xf32>
    %10 = tpu.iota {dimensions = array<i32: 0>} : vector<8x8xi32>
    %11 = vector.broadcast %4 : i32 to vector<8x8xi32>
    %12 = arith.addi %11, %10 : vector<8x8xi32>
    %13 = tpu.iota {dimensions = array<i32: 1>} : vector<8x8xi32>
    %14 = arith.cmpi sle, %13, %12 : vector<8x8xi32>
    %cst_5 = arith.constant -2.38197633E+38 : f32
    %15 = vector.broadcast %cst_5 : f32 to vector<8x8xf32>
    %16 = arith.select %14, %9, %15 : vector<8x8xi1>, vector<8x8xf32>
    %cst_6 = arith.constant dense<0xFF800000> : vector<8xf32>
    %17 = vector.multi_reduction <maximumf>, %16, %cst_6 [1] : vector<8x8xf32> to vector<8xf32>
    %18 = vector.shape_cast %17 : vector<8xf32> to vector<8x1xf32>
    %19 = vector.broadcast %18 : vector<8x1xf32> to vector<8x8xf32>
    %20 = arith.subf %16, %19 : vector<8x8xf32>
    %21 = math.exp %20 : vector<8x8xf32>
    %22 = arith.truncf %21 : vector<8x8xf32> to vector<8x8xbf16>
    %cst_7 = arith.constant dense<0.000000e+00> : vector<8x16xf32>
    %23 = tpu.matmul %22, %8, %cst_7 {dimension_numbers = #tpu.dot_dimension_numbers<[1], [0], [0], [1], [0, 0, 1, 1], [], []>} : vector<8x8xbf16>, vector<8x16xbf16>, vector<8x16xf32> -> vector<8x16xf32>
    %cst_8 = arith.constant 1.000000e+00 : bf16
    %24 = vector.broadcast %cst_8 : bf16 to vector<8x1xbf16>
    %cst_9 = arith.constant dense<0.000000e+00> : vector<8x1xf32>
    %25 = tpu.matmul %22, %24, %cst_9 {dimension_numbers = #tpu.dot_dimension_numbers<[1], [0], [0], [1], [0, 0, 1, 1], [], []>} : vector<8x8xbf16>, vector<8x1xbf16>, vector<8x1xf32> -> vector<8x1xf32>
    %26 = tpu.reciprocal %25 : vector<8x1xf32> -> vector<8x1xf32>
    %27 = vector.broadcast %26 : vector<8x1xf32> to vector<8x16xf32>
    %28 = arith.mulf %23, %27 : vector<8x16xf32>
    %c0_10 = arith.constant 0 : index
    %c0_11 = arith.constant 0 : index
    %c0_12 = arith.constant 0 : index
    %29 = vector.load %arg4[%c0_10, %c0_11, %c0_12] : memref<1x8x16xf32, #tpu.memory_space<vmem>>, vector<1x8x16xf32>
    %30 = vector.shape_cast %29 : vector<1x8x16xf32> to vector<8x16xf32>
    %31 = vector.shape_cast %28 : vector<8x16xf32> to vector<1x8x16xf32>
    tpu.vector_store %arg4[%c0_10, %c0_11, %c0_12], %31 {strides = array<i32>} : memref<1x8x16xf32, #tpu.memory_space<vmem>>, vector<1x8x16xf32>,
    return
  }
  func.func @transform_0(%arg0: i32, %arg1: i32) -> (i32, i32, i32) {
    %c0_i32 = arith.constant 0 : i32
    %c0_i32_0 = arith.constant 0 : i32
    %c0_i32_1 = arith.constant 0 : i32
    return %arg0, %c0_i32, %c0_i32_0 : i32, i32, i32
  }
  func.func @transform_1(%arg0: i32, %arg1: i32) -> (i32, i32) {
    %c0_i32 = arith.constant 0 : i32
    %c0_i32_0 = arith.constant 0 : i32
    %c0_i32_1 = arith.constant 0 : i32
    return %c0_i32, %c0_i32_0 : i32, i32
  }
  func.func @transform_2(%arg0: i32, %arg1: i32) -> (i32, i32, i32) {
    %c0_i32 = arith.constant 0 : i32
    %c0_i32_0 = arith.constant 0 : i32
    return %arg0, %arg1, %c0_i32 : i32, i32, i32
  }
}

</mosaic_0001>

<bundles_post_ra>
// kernel: tpu_custom_call.1
= control target key start
LH: loop header
LB: loop body
LE: loop exit
PB: predicated region body
PF: predicated region fallthrough
CT: control target
= control target key end

     0   :  { %7 = vsyncpa [#allocation6], 0  ;;  %s873_s0 = inlined_call_operand.hbm [shape: f32[2,8,32], index: 0, kind: input, shape index: {}]   ;;  %s874_s1 = inlined_call_operand.hbm [shape: f32[32,48], index: 1, kind: input, shape index: {}]   ;;  %s875_s2 = inlined_call_operand.hbm [shape: f32[2,8,16], index: 2, kind: output, shape index: {}]  }
   0x1   :  { %9 = vsyncpa [#allocation6 + $0x1], 0 }
   0x2   :  { %10 = vsyncpa [#allocation9], 0 }
   0x3   :  { %11 = vsyncpa [#allocation7], 0 }
   0x4   :  { %13 = vsyncpa [#allocation7 + $0x1], 0  ;;  %s718_s9 = smov 0   ;;  %s720_s10 = smov 0  }
   0x5   :  { %s722_s11 = smov 0   ;;  %s724_s12 = smov 0  }
   0x6   :  { %s726_s13 = smov 0   ;;  %s728_s14 = smov 0  }
   0x7 LB: > { %s446_s15 = sadd.s32 4294967295, %s695_s14   ;;  %p448_p0 = scmp.ge.s32.totalorder %s695_s14, 1  ;;  %s695_s14 = sphi %s728_s14, %s19_s14   ;;  %s691_s13 = sphi %s726_s13, %s886_s13   ;;  %s687_s12 = sphi %s724_s12, %s885_s12   ;;  %s683_s11 = sphi %s722_s11, %s884_s11   ;;  %s679_s10 = sphi %s720_s10, %s883_s10   ;;  %s675_s9 = sphi %s718_s9, %s882_s9  }
   0x8   : > { %p750_p1 = scmp.eq.s32.totalorder %s446_s15, 0  ;;  %p111_p2 = scmp.lt.s32.totalorder %s695_s14, 3 }
   0x9   : > { %s122_s19 = sshll.u32 %s874_s1, 4  ;;  %s697_s21 = smov [#allocation8]   ;;  %s123_s19 = int_to_ptr.hbm [resolvable:$true] %s122_s19 }
   0xa   : > { %p758_p3 = pnand %p448_p0, %p111_p2  ;;  %s124_s22 = sshll.u32 %s697_s21, 4  ;;  %s125_s22 = int_to_ptr.vmem [resolvable:$true] %s124_s22 }
   0xb   : > { %p450_p6 = scmp.ge.s32.totalorder %s695_s14, 2  ;;  %s698_s23 = smov 128  }
   0xc   : > { %p473_p4 = pneg %p758_p3  ;;  %s699_s24 = smov 8  }
   0xd   : > { %s447_s25 = sadd.s32 4294967294, %s695_s14   ;;  %s31_s26 = sadd.s32 1, %s691_s13 }
   0xe   : > { %p474_p5 = pnand %p473_p4, %p750_p1  ;;  %s38_s27 = sadd.s32 1, %s683_s11 }
   0xf   : > { %p33_p7 = scmp.ge.s32.totalorder %s31_s26, 2  ;;  %p45_p8 = scmp.ne.s32.totalorder %s683_s11, %s679_s10 }
  0x10   : > { %476 = dma.hbm_to_vmem [thread:$0]  (!%p474_p5), %s123_s19, 512, %s125_s22, [#allocation9], %s698_s23, %s698_s23, %s699_s24  }
  0x11   : > { %p46_p9 = scmp.eq.s32.totalorder %s695_s14, 0  ;;  %p51_p10 = scmp.ne.s32.totalorder %s679_s10, %s675_s9 }
  0x12   : > { %s888_s26 = smov (%p33_p7, %s31_s26), 0  ;;  %p98_p13 = scmp.eq.s32.totalorder %s446_s15, 1 }
  0x13   : > { %p777_p11 = por %p46_p9, %p45_p8  ;;  %p783_p12 = por %p750_p1, %p51_p10 }
  0x14   : > { %s35_s30 = ssub.s32 %s691_s13, %s888_s26  ;;  %p104_p2 = scmp.eq.s32.totalorder %s447_s25, 1 }
  0x15   : > { %p36_p0 = scmp.eq.s32.totalorder %s35_s30, 0  ;;  %p789_p4 = por %p98_p13, %p45_p8 }
  0x16   : > { %p486_p5 = scmp.lt.s32.totalorder %s695_s14, 2  ;;  %p797_p7 = por %p104_p2, %p51_p10 }
  0x17   : > { %s795_s4 = scalar_select %p36_p0, %s683_s11, %s38_s27  }
  0x18   : > { %s138_s6 = sand.u32 1, %s683_s11   ;;  %s452_s8 = sshll.u32 %s691_s13, 3 }
  0x19   : > { %s451_s7 = sshll.u32 %s138_s6, 3  ;;  %s146_s15 = scalar_lea.hbm %s873_s0, %s452_s8 }
  0x1a   : > { %s142_s19 = scalar_lea.vmem [#allocation5], %s451_s7  ;;  %s148_s22 = sshll.u32 %s146_s15, 4  ;;  %s149_s22 = int_to_ptr.hbm [resolvable:$true] %s148_s22 }
  0x1b   : > { %s150_s21 = sshll.u32 %s142_s19, 4  ;;  %p478_p8 = pnand %p486_p5, %p777_p11  ;;  %s151_s21 = int_to_ptr.vmem [resolvable:$true] %s150_s21 }
  0x1c   : > { %s139_s23 = scalar_lea.sflag [#allocation6], %s138_s6  ;;  %159 = sbr.rel (%p758_p3) target bundleno = 832 (0x340), region = 28 }
  0x1d   : > { %480 = dma.hbm_to_vmem [thread:$0]  (!%p478_p8), %s149_s22, 128, %s151_s21, %s139_s23  }
  0x1e   : > { %s811_s24 = sand.u32 (!%p758_p3), 1, %s679_s10  }
  0x1f   : > { %s454_s25 = sshll.u32 (!%p758_p3), %s811_s24, 3  ;;  %s162_s27 = scalar_lea.sflag (!%p758_p3), [#allocation6], %s811_s24 }
  0x20   : > { %s165_s30 = scalar_lea.vmem (!%p758_p3), [#allocation5], %s454_s25 }
  0x21   : > { %662 = dma.done.wait (%p783_p12), %s162_s27, 128  }
  0x22   : > { %664 = vsyncadd (%p783_p12), %s162_s27, 4294967168 }
  0x23   : > { %666 = dma.done.wait (%p750_p1), [#allocation9], 512  }
  0x24   : > { %668 = vsyncadd (%p750_p1), [#allocation9], 4294966784  ;;  %v202_v0 = vld [vmem:[#allocation8 + $0x10] sm:$0xff]  ;;  %v203_v1 = vld [vmem:[#allocation8 + $0x18] sm:$0xff]  ;;  %vm206_vm0 = vcmask 261120   ;;  %vm225_vm1 = vcmask 125952   ;;  %v265_v20 = vlaneseq }
  0x25   : > { %v200_v2 = vld [vmem:[#allocation8] sm:$0xff]  ;;  %v205_v3 = vpack.c.bf16 %v203_v1, %v202_v0  ;;  %v201_v4 = vld [vmem:[#allocation8 + $0x8] sm:$0xff]  ;;  %v198_v6 = vld [vmem:[%s165_s30] sm:$0xff]  ;;  %s700_s20 = smov 96   ;;  %s701_s16 = smov 112   ;;  %vm284_vm2 = vcmask 1043456  }
  0x26   : > { %v204_v5 = vpack.c.bf16 %v201_v4, %v200_v2  ;;  %v199_v7 = vpack.c.bf16 %v198_v6, %v198_v6  ;;  %vm245_vm3 = vcmask 130048   ;;  %v266_v21 = vshrl.u32 %v265_v20, 7  ;;  %s462_s28 = sshll.u32 %s687_s12, 3  ;;  %s191_s8 = scalar_lea.vmem [#allocation10], %s454_s25 }
  0x27   : > { %216 = vmatpush.bf16.msra.mxu0 %v205_v3  ;;  %v270_v22 = vand.u32 127, %v265_v20  ;;  %vm273_vm5 = vcmask 64512   ;;  %v702_v27 = vmov 0   ;;  %s350_s7 = scalar_lea.hbm %s875_s2, %s462_s28  ;;  %s352_s17 = sshll.u32 %s191_s8, 4  ;;  %s353_s17 = int_to_ptr.vmem [resolvable:$true] %s352_s17 }
  0x28   : > { %v302_v28 = vsel %vm284_vm2, 1065369472, %v702_v27  ;;  %543 = vset.pattern.permute.xlu1 %v702_v27  ;;  %544 = vset.pattern.permute.xlu0 %v702_v27  ;;  %s354_s18 = sshll.u32 %s350_s7, 4  ;;  %s339_s15 = scalar_lea.sflag [#allocation7], %s811_s24  ;;  %s355_s18 = int_to_ptr.hbm [resolvable:$true] %s354_s18 }
  0x29   : > { %vm271_vm4 = vcmp.le.s32.totalorder %v270_v22, %v266_v21  ;;  %311 = vmatpush.bf16.msra.mxu3 %v302_v28  ;;  %s623_s19 = sshra.s32 %s355_s18, 4  ;;  %s629_s23 = scalar_lea.hbm %s875_s2, 16  ;;  %s624_s19 = int_to_ptr.hbm [resolvable:$true] %s623_s19 }
  0x2a   : > { %s625_s21 = scalar_lea.hbm %s624_s19, 8  ;;  %p630_p10 = scmp.lt.s32.totalorder %s624_s19, %s875_s2 }
  0x2b   : > { %217 = vmatpush.bf16.msra.mxu0 %v204_v5  ;;  %p626_p1 = scmp.ne.s32.totalorder %s624_s19, %s625_s21  ;;  %p631_p11 = scmp.lt.s32.totalorder %s629_s23, %s625_s21 }
  0x2d   : > { %p627_p3 = pnand %p626_p1, %p789_p4  ;;  %p632_p12 = por %p631_p11, %p630_p10 }
  0x2e   : > { %457 = vmatmul.msk.bf16.vlgmr.msra.gmra.mxu0 %vm206_vm0, %v199_v7 }
  0x2f   : > { %p628_p9 = pneg %p627_p3 }
  0x31   : > { %p633_p13 = pnand %p632_p12, %p628_p9 }
  0xab   : > { %v219_v8 = vpop.f32.mrf.mxu0 }
  0xac   : > { %v223_v9 = vmul.f32 0.17677669, %v219_v8  ;;  %v227_v10 = vpack.c.bf16 %v219_v8, %v219_v8 }
  0xae   : > { %v224_v11 = vpack.c.bf16 %v223_v9, %v223_v9  ;;  %233 = vrot.lane.b32.xlu1 %v227_v10, %s700_s20  ;;  %229 = vrot.lane.b32.xlu0 %v227_v10, %s701_s16 }
  0xb0   : > { %226 = vst.msk [vmem:[#allocation2] sm:$0xf] %vm225_vm1, %v224_v11 }
  0xb3   : > { %v221_v12 = vpop.f32.mrf.mxu0 }
  0xb7   : > { %v242_v19 = vld [vmem:[#allocation2] sm:$0xf] }
 0x120   : > { %v234_v13 = vpop.permute.xlu1 %233  ;;  %v230_v14 = vpop.permute.xlu0 %229 }
 0x121   : > { %236 = vst.msk [vmem:[#allocation4] sm:$0xf] %vm225_vm1, %v234_v13 }
 0x122   : > { %232 = vst.msk [vmem:[#allocation3] sm:$0xf] %vm225_vm1, %v230_v14 }
 0x128   : > { %v244_v15 = vld [vmem:[#allocation4] sm:$0xf] }
 0x129   : > { %v243_v16 = vld [vmem:[#allocation3] sm:$0xf]  ;;  %v286_v17 = vsel %vm284_vm2, %v244_v15, 0 }
 0x12a   : > { %v250_v18 = vsel %vm245_vm3, %v243_v16, 0  ;;  %295 = vmatpush.bf16.msra.mxu2 %v286_v17 }
 0x12b   : > { %259 = vmatpush.bf16.xpose.msra.mxu1 %v250_v18 }
 0x132   : > { %458 = vmatmul.msk.bf16.vlgmr.msra.gmra.mxu1 %vm245_vm3, %v242_v19 }
 0x1af   : > { %v261_v23 = vpop.f32.mrf.mxu1 }
 0x1b0   : > { %v272_v24 = vsel %vm271_vm4, %v261_v23, -2.3819763e+38 }
 0x1b1   : > { %v274_v25 = vsel %vm273_vm5, %v272_v24, -inf }
 0x1b2   : > { %275 = vmax.xlane.f32.xlu0 %v274_v25 }
 0x1b7   : > { %v263_v26 = vpop.f32.mrf.mxu1 }
 0x225   : > { %v276_v29 = vpop.xlane.xlu0 %275 }
 0x226   : > { %v277_v30 = vsub.f32 %v272_v24, %v276_v29 }
 0x228   : > { %v278_v31 = vmul.f32 1.442695, %v277_v30 }
 0x22a   : > { %545 = vpow2.f32 %v278_v31 }
 0x230   : > { %v546_v32 = vpop.eup %545 }
 0x231   : > { %v280_v33 = vpack.c.bf16 %v546_v32, %v546_v32 }
 0x233   : > { %459 = vmatmul.msk.bf16.vlgmr.msra.gmra.mxu2 %vm273_vm5, %v280_v33  ;;  %460 = vmatmul.msk.bf16.vlgmr.msra.gmra.mxu3 %vm273_vm5, %v280_v33 }
 0x2b6   : > { %v297_v34 = vpop.f32.mrf.mxu2  ;;  %v313_v35 = vpop.f32.mrf.mxu3 }
 0x2b7   : > { %547 = vrcp.f32 %v313_v35  ;;  %v328_v41 = vand.u32 2147483648, %v313_v35  ;;  %v326_v43 = vand.u32 2147483647, %v313_v35  ;;  %vm322_vm7 = vweird.f32 %v313_v35 }
 0x2b9   : > { %v329_v45 = vor.u32 1.1754944e-38, %v328_v41  ;;  %vm327_vm9 = vcmp.eq.f32.partialorder %v326_v43, 8.507059e+37 }
 0x2bd   : > { %v548_v36 = vpop.eup %547 }
 0x2be   : > { %v318_v37 = vmul.f32 %v548_v36, %v313_v35  ;;  %v299_v38 = vpop.f32.mrf.mxu2  ;;  %v315_v39 = vpop.f32.mrf.mxu3  ;;  %vm323_vm6 = vweird.f32 %v548_v36 }
 0x2bf   : > { %vm324_vm8 = vmor %vm322_vm7, %vm323_vm6 }
 0x2c0   : > { %v319_v40 = vsub.f32 1.0, %v318_v37 }
 0x2c2   : > { %v320_v42 = vmul.f32 %v548_v36, %v319_v40 }
 0x2c4   : > { %v321_v44 = vadd.f32 %v548_v36, %v320_v42 }
 0x2c6   : > { %v325_v46 = vsel %vm324_vm8, %v548_v36, %v321_v44 }
 0x2c7   : > { %v330_v47 = vsel %vm327_vm9, %v329_v45, %v325_v46 }
 0x2c8   : > { %333 = vperm.xlu1 %543, %v330_v47  }
 0x33a   : > { %v334_v48 = vpop.permute.xlu1 %333 }
 0x33b   : > { %v336_v49 = vmul.f32 %v334_v48, %v297_v34 }
 0x33d   : > { %337 = vst.msk [vmem:[%s191_s8] sm:$0xff] %vm245_vm3, %v336_v49 }
 0x33e   : > { %636 = shalt.err (!%p633_p13)
}
 0x33f   : > { %471 = dma.vmem_to_hbm [thread:$0]  (%p789_p4), %s353_s17, 128, %s355_s18, %s339_s15  }
 0x340 PF: > { %s366_s24 = sand.u32 1, %s675_s9   ;;  %p482_p0 = pnand %p450_p6, %p797_p7 }
 0x341   : > { %s367_s30 = scalar_lea.sflag [#allocation7], %s366_s24 }
 0x342   : > { %p483_p2 = pneg %p482_p0 }
 0x344   : > { %670 = dma.done.wait (%p483_p2), %s367_s30, 128  }
 0x345   : > { %672 = vsyncadd (%p483_p2), %s367_s30, 4294967168  ;;  %s19_s14 = sadd.s32 1, %s695_s14   ;;  %s882_s9 = smov %s679_s10 }
 0x346   : > { %p16_p5 = scmp.ge.s32.totalorder %s19_s14, 4   ;;  %s883_s10 = smov %s683_s11 }
 0x347   : > { %s884_s11 = smov %s795_s4  ;;  %s885_s12 = smov %s691_s13 }
 0x348   : > { %s886_s13 = smov %s888_s26  ;;  %18 = sbr.rel (!%p16_p5) target bundleno = 7 (0x7), region = 82 }
 0x34d   :  { %373 = vsyncpa [#allocation6], 1 }
 0x34e   :  { %375 = vsyncpa [#allocation6 + $0x1], 1 }
 0x34f   :  { %376 = vsyncpa [#allocation9], 1 }
 0x350   :  { %377 = vsyncpa [#allocation7], 1 }
 0x351   :  { %379 = vsyncpa [#allocation7 + $0x1], 1 }

</bundles_post_ra>
